<compile_context>
chip_gen: v6e
topology: v6e:2x2x1
jax: 0.10.0
libtpu: 0.0.40
codegen_flags: <defaults>
</compile_context>

<pallas_src>
import math
from functools import partial

import numpy as np
import jax
import jax.numpy as jnp
from jax import lax
from jax.experimental import pallas as pl
from jax.experimental.pallas import tpu as pltpu


# ---------------------------------------------------------------------------
# In-kernel helpers
# ---------------------------------------------------------------------------
def _gelu_erf(x):
    # nn.GELU() (erf form) via Abramowitz–Stegun 7.1.26 (|erf err| < 1.5e-7).
    # exp and the approximate reciprocal both run on the EUP slot.
    z = x * 0.7071067811865476
    az = jnp.abs(z)
    t = pl.reciprocal(1.0 + 0.3275911 * az, approx=True)
    poly = ((((1.061405429 * t - 1.453152027) * t + 1.421413741) * t
             - 0.284496736) * t + 0.254829592) * t
    erf_abs = 1.0 - poly * jnp.exp(-az * az)
    erf = jnp.where(z >= 0.0, erf_abs, -erf_abs)
    return 0.5 * x * (1.0 + erf)


# ---------------------------------------------------------------------------
# Kernel 1: fused PreConv + circular TokenEmbedding + positional embedding
# ---------------------------------------------------------------------------
def _embedding_kernel(x_ref, wpre_ref, wtok_ref, pe_ref, o_ref, *, B, T, K):
    # x_ref   : (B, L, C_in)      channel-last input
    # wpre_ref: (K*C_in, D) bf16  PreConv im2col weights (tap-major, chan-minor)
    # wtok_ref: (K*D,   D)  bf16  TokenEmbedding im2col weights
    # pe_ref  : (B*T, D)  f32     positional embedding, pre-tiled over batch
    # o_ref   : (B*T, D)  f32
    # --- PreConv (valid conv, k=K) + ReLU as ONE im2col matmul --------------
    rows = []
    for b in range(B):
        xb = x_ref[b]                                          # (L, C_in)
        rows.append(jnp.concatenate([xb[j:j + T, :] for j in range(K)], axis=1))
    pre_in = rows[0] if B == 1 else jnp.concatenate(rows, axis=0)   # (B*T, K*C_in)
    v = jnp.dot(pre_in.astype(jnp.bfloat16), wpre_ref[...],
                preferred_element_type=jnp.float32)
    v = jnp.maximum(v, 0.0)                                    # (B*T, D)
    # --- circular TokenEmbedding conv (k=3, pad=1) as ONE matmul ------------
    prev_parts, next_parts = [], []
    for b in range(B):
        vb = v[b * T:(b + 1) * T, :]                           # 8-aligned (T, D)
        prev_parts.append(pltpu.roll(vb, 1, 0))                # v[(t-1) mod T]
        next_parts.append(pltpu.roll(vb, T - 1, 0))            # v[(t+1) mod T]
    v_prev = prev_parts[0] if B == 1 else jnp.concatenate(prev_parts, axis=0)
    v_next = next_parts[0] if B == 1 else jnp.concatenate(next_parts, axis=0)
    tok_in = jnp.concatenate([v_prev, v, v_next], axis=1)      # (B*T, 3*D)
    emb = jnp.dot(tok_in.astype(jnp.bfloat16), wtok_ref[...],
                  preferred_element_type=jnp.float32)
    o_ref[...] = emb + pe_ref[...]          # nn.Dropout is identity in eval mode


def pallas_embedding(x_cl, wpre2, wtok2, pe_tiled, *, T):
    B, L, C_in = x_cl.shape
    D = wpre2.shape[1]
    K = wpre2.shape[0] // C_in
    kernel = partial(_embedding_kernel, B=B, T=T, K=K)
    return pl.pallas_call(
        kernel,
        out_shape=jax.ShapeDtypeStruct((B * T, D), jnp.float32),
        grid=(1,),
        in_specs=[
            pl.BlockSpec((B, L, C_in), lambda i: (0, 0, 0)),
            pl.BlockSpec(wpre2.shape, lambda i: (0, 0)),
            pl.BlockSpec(wtok2.shape, lambda i: (0, 0)),
            pl.BlockSpec((B * T, D), lambda i: (0, 0)),
        ],
        out_specs=pl.BlockSpec((B * T, D), lambda i: (0, 0)),
    )(x_cl.astype(jnp.float32), wpre2, wtok2, pe_tiled)


# ---------------------------------------------------------------------------
# Kernel 2: fused TimesBlock (all periods, inception1 -> GELU -> inception2,
#           weighted aggregation + residual) with big-K im2col matmuls.
# ---------------------------------------------------------------------------
def _timesblock_kernel(sm_ref, x_ref, b1_ref, b2_ref, *rest, B, T, branch_meta):
    # sm_ref : SMEM (k, B) softmax period weights
    # x_ref  : (B*T, N)  embedding (also the residual)
    # b1_ref : (1, d_ff) mean inception-1 bias
    # b2_ref : (1, N)    mean inception-2 bias
    # rest   : per period branch (mask1, mask2, w1, w2) refs, then o_ref
    o_ref = rest[-1]
    branch_refs = rest[:-1]
    N = x_ref.shape[1]
    x_all = x_ref[...]                        # residual, (B*T, N)
    acc = x_all
    b1 = b1_ref[...]
    b2 = b2_ref[...]

    def conv_stage(src, mask_ref, w_ref, bias_row, deltas, rows):
        # One fused im2col matmul: lane-concat the rolled copies, mask once
        # (trace-time-precomputed mask), single big-K bf16 MXU matmul.
        cols = [src if d == 0 else pltpu.roll(src, (-d) % rows, 0)
                for d in deltas]
        a = cols[0] if len(cols) == 1 else jnp.concatenate(cols, axis=1)
        a = (a * mask_ref[...]).astype(jnp.bfloat16)
        return jnp.dot(a, w_ref[...],
                       preferred_element_type=jnp.float32) + bias_row

    for i, (lp, deltas) in enumerate(branch_meta):
        mask1_ref, mask2_ref, w1_ref, w2_ref = branch_refs[4 * i:4 * i + 4]
        rows = B * lp
        # zero-pad each batch segment to lp rows (multiple of 8 so every slice
        # below is sublane-tile aligned); rows [T, lp) are zeros.
        if lp == T:
            zf = x_all
        else:
            pieces = []
            for b in range(B):
                pieces.append(x_all[b * T:(b + 1) * T, :])
                pieces.append(jnp.zeros((lp - T, N), jnp.float32))
            zf = jnp.concatenate(pieces, axis=0)               # (B*lp, N)
        z1 = _gelu_erf(conv_stage(zf, mask1_ref, w1_ref, b1, deltas, rows))
        z2 = conv_stage(z1, mask2_ref, w2_ref, b2, deltas, rows)   # (B*lp, N)
        # truncate padded rows, weight by softmax(period_weight), accumulate
        segs = [z2[b * lp:b * lp + T, :] * sm_ref[i, b] for b in range(B)]
        acc = acc + (segs[0] if B == 1 else jnp.concatenate(segs, axis=0))

    o_ref[...] = acc                          # single full-tensor store


def pallas_timesblock(x_flat, sm, b1_eff, b2_eff, branch_arrays, branch_meta,
                      *, B, T):
    N = x_flat.shape[1]
    kernel = partial(_timesblock_kernel, B=B, T=T, branch_meta=branch_meta)
    flat_inputs = [sm, x_flat, b1_eff, b2_eff]
    in_specs = [
        pl.BlockSpec(memory_space=pltpu.MemorySpace.SMEM),     # (k, B) weights
        pl.BlockSpec((B * T, N), lambda i: (0, 0)),
        pl.BlockSpec(b1_eff.shape, lambda i: (0, 0)),
        pl.BlockSpec(b2_eff.shape, lambda i: (0, 0)),
    ]
    for arrs in branch_arrays:                                 # (m1, m2, w1, w2)
        for a in arrs:
            flat_inputs.append(a)
            in_specs.append(pl.BlockSpec(a.shape, lambda i: (0, 0)))
    return pl.pallas_call(
        kernel,
        out_shape=jax.ShapeDtypeStruct((B * T, N), jnp.float32),
        grid=(1,),
        in_specs=in_specs,
        out_specs=pl.BlockSpec((B * T, N), lambda i: (0, 0)),
    )(*flat_inputs)


# ---------------------------------------------------------------------------
# Plain-JAX / host glue (allowed): FFT period detection, softmax, restacking
# ---------------------------------------------------------------------------
def positional_embedding(T, D):
    pos = np.arange(T, dtype=np.float32)[:, None]
    div = np.exp(np.arange(0, D, 2, dtype=np.float32) * (-math.log(10000.0) / D))
    pe = np.zeros((T, D), np.float32)
    pe[:, 0::2] = np.sin(pos * div)
    pe[:, 1::2] = np.cos(pos * div)
    return pe


def fft_for_period(x, k):
    # TODO(synk): rfft + data-dependent top-k period selection stays in XLA with
    #             a host sync (same as torch .detach().cpu().numpy() in the
    #             reference); a fully-jittable variant needs static max-length
    #             padding + scalar-prefetched geometry/masks.
    xf = jnp.fft.rfft(x, axis=1)
    amp = jnp.abs(xf)                              # (B, F, C)
    freq = amp.mean(axis=0).mean(axis=-1)          # (F,)
    freq = freq.at[0].set(0.0)
    _, top_idx = lax.top_k(freq, k)
    top_idx = np.asarray(top_idx)                  # concrete (eager execution)
    top_idx = np.maximum(top_idx, 1)               # guard T // 0 degenerate case
    periods = x.shape[1] // top_idx
    period_weight = amp.mean(axis=-1)[:, top_idx]  # (B, k)
    return periods, period_weight


def _build_branch(period, *, seq_len, B, N, d_ff, num_kernels,
                  w1_params, w2_params, kernel_sizes):
    """Trace-time constants for one period branch: masks, stacked weights, meta."""
    p = int(period)
    length = seq_len if seq_len % p == 0 else (seq_len // p + 1) * p
    H, W = length // p, p
    assert H * W == length, "period folding invariant violated"
    lp = ((length + 7) // 8) * 8                  # 8-align each batch segment

    # active taps (prune taps whose receptive field lies entirely in padding)
    active = []
    for ks in kernel_sizes:
        c = ks // 2
        for dy in range(ks):
            for dx in range(ks):
                if abs(dy - c) >= H or abs(dx - c) >= W:
                    continue
                active.append((ks, dy, dx, (dy - c) * W + (dx - c)))
    deltas = tuple(d for (_, _, _, d) in active)

    # per-row tap validity masks (pure numpy, trace-time)
    pos = np.arange(lp)
    inside = pos < length
    h = np.where(inside, pos // W, 0)
    w = np.where(inside, pos % W, 0)
    m = np.zeros((lp, len(active)), np.float32)
    for t, (ks, dy, dx, _) in enumerate(active):
        c = ks // 2
        hh, ww = h + dy - c, w + dx - c
        m[:, t] = (inside & (hh >= 0) & (hh < H)
                   & (ww >= 0) & (ww < W)).astype(np.float32)
    m = np.tile(m, (B, 1))                        # (B*lp, n_act), same per batch
    mask1 = jnp.asarray(np.repeat(m, N, axis=1))       # (B*lp, n_act*N)
    mask2 = jnp.asarray(np.repeat(m, d_ff, axis=1))    # (B*lp, n_act*d_ff)

    # stacked tap weights in identical tap order, 1/num_kernels folded, bf16
    inv_nk = 1.0 / num_kernels
    w1_blocks = [jnp.transpose(w1_params[kernel_sizes.index(ks)][:, :, dy, dx])
                 for (ks, dy, dx, _) in active]         # each (N, d_ff)
    w2_blocks = [jnp.transpose(w2_params[kernel_sizes.index(ks)][:, :, dy, dx])
                 for (ks, dy, dx, _) in active]         # each (d_ff, N)
    w1 = (jnp.concatenate(w1_blocks, axis=0) * inv_nk).astype(jnp.bfloat16)
    w2 = (jnp.concatenate(w2_blocks, axis=0) * inv_nk).astype(jnp.bfloat16)
    return (mask1, mask2, w1, w2), (lp, deltas)


def times_block(x_flat, params, *, B, seq_len, top_k, emb_dim, d_ff, num_kernels):
    T, N = seq_len, emb_dim
    emb3 = x_flat.reshape(B, T, N)
    periods, period_weight = fft_for_period(emb3, top_k)
    kernel_sizes = tuple(2 * j + 1 for j in range(num_kernels))

    branch_arrays, branch_meta = [], []
    for i in range(top_k):
        arrs, meta = _build_branch(periods[i], seq_len=T, B=B, N=N, d_ff=d_ff,
                                   num_kernels=num_kernels,
                                   w1_params=params["inc1_w"],
                                   w2_params=params["inc2_w"],
                                   kernel_sizes=kernel_sizes)
        branch_arrays.append(arrs)
        branch_meta.append(meta)

    # softmax period weights -> (k, B); consumed as SMEM scalars in-kernel
    sm = jnp.transpose(jax.nn.softmax(period_weight, axis=1)).astype(jnp.float32)
    b1_eff = (sum(params["inc1_b"]) / num_kernels).reshape(1, d_ff).astype(jnp.float32)
    b2_eff = (sum(params["inc2_b"]) / num_kernels).reshape(1, N).astype(jnp.float32)

    return pallas_timesblock(x_flat, sm, b1_eff, b2_eff,
                             branch_arrays, tuple(branch_meta), B=B, T=T)


def timesnet_encoder_forward(x, params, cfg):
    """x: (B, C_in, L)  ->  (B, emb_dim, L-2)"""
    B, C_in, L = x.shape
    D = cfg["emb_dim"]
    T = L - 2                                     # Conv1d(k=3, stride=1, no pad)

    x_cl = jnp.transpose(x, (0, 2, 1))            # (B, L, C_in) channel-last
    wpre2 = (jnp.transpose(params["preconv_w"], (2, 1, 0))
             .reshape(3 * C_in, D).astype(jnp.bfloat16))        # (3*C_in, D)
    wtok2 = (jnp.transpose(params["token_w"], (2, 1, 0))
             .reshape(3 * D, D).astype(jnp.bfloat16))           # (3*D, D)
    pe_tiled = jnp.asarray(np.tile(positional_embedding(T, D), (B, 1)))  # (B*T, D)

    emb_flat = pallas_embedding(x_cl, wpre2, wtok2, pe_tiled, T=T)   # (B*T, D)

    out_flat = times_block(emb_flat, params, B=B, seq_len=cfg["seq_len"],
                           top_k=cfg["top_k"], emb_dim=D, d_ff=cfg["d_ff"],
                           num_kernels=cfg["num_kernels"])           # (B*T, D)

    return jnp.transpose(out_flat.reshape(B, T, D), (0, 2, 1))       # (B, D, T)


# ---------------------------------------------------------------------------
# Deterministic parameter init (synthetic; shapes follow the PyTorch __init__)
# ---------------------------------------------------------------------------
def init_params(key, in_channel, emb_dim, d_ff, num_kernels):
    def kaiming(k, shape, fan_in):
        return jax.random.normal(k, shape, jnp.float32) * math.sqrt(2.0 / fan_in)

    keys = jax.random.split(key, 2 + 4 * num_kernels)
    params = {
        "preconv_w": kaiming(keys[0], (emb_dim, in_channel, 3), in_channel * 3),
        "token_w": kaiming(keys[1], (emb_dim, emb_dim, 3), emb_dim * 3),
        "inc1_w": [], "inc1_b": [], "inc2_w": [], "inc2_b": [],
    }
    idx = 2
    for i in range(num_kernels):
        ks = 2 * i + 1
        params["inc1_w"].append(kaiming(keys[idx], (d_ff, emb_dim, ks, ks), emb_dim * ks * ks)); idx += 1
        params["inc1_b"].append(0.02 * jax.random.normal(keys[idx], (d_ff,), jnp.float32)); idx += 1
        params["inc2_w"].append(kaiming(keys[idx], (emb_dim, d_ff, ks, ks), d_ff * ks * ks)); idx += 1
        params["inc2_b"].append(0.02 * jax.random.normal(keys[idx], (emb_dim,), jnp.float32)); idx += 1
    return params


# ---------------------------------------------------------------------------
if __name__ == "__main__":
    key = jax.random.PRNGKey(0)
    kx, kp = jax.random.split(key)

    # TimesNetEncoder(in_channel=2, emb_dim=32, emb_type='fixed', freq='h',
    #                 dropout=0.1, seq_len=16, top_k=2, d_ff=32, num_kernels=3)
    B, C_in, L = 2, 2, 18
    emb_dim, d_ff, top_k, num_kernels = 32, 32, 2, 3
    seq_len = L - 2  # length after PreConv (k=3, stride=1)

    x = jax.random.normal(kx, (B, C_in, L), jnp.float32)
    params = init_params(kp, C_in, emb_dim, d_ff, num_kernels)
    cfg = dict(emb_dim=emb_dim, d_ff=d_ff, top_k=top_k,
               num_kernels=num_kernels, seq_len=seq_len)

    out = timesnet_encoder_forward(x, params, cfg)
    out = jax.block_until_ready(out)
    assert out.shape == (B, emb_dim, seq_len), out.shape
    assert jnp.all(jnp.isfinite(out))
    print("KERNEL_OK")
</pallas_src>

<mosaic_0001>
module attributes {stable_mosaic.version = 11 : i64} {
  func.func @_embedding_kernel(%arg0: i32, %arg1: memref<2x18x2xf32, #tpu.memory_space<vmem>>, %arg2: memref<6x32xbf16, #tpu.memory_space<vmem>>, %arg3: memref<96x32xbf16, #tpu.memory_space<vmem>>, %arg4: memref<32x32xf32, #tpu.memory_space<vmem>>, %arg5: memref<32x32xf32, #tpu.memory_space<vmem>>) attributes {dimension_semantics = [#tpu.dimension_semantics<arbitrary>], iteration_bounds = array<i64: 1>, scalar_prefetch = 0 : i64, scratch_operands = 0 : i64, tpu.core_type = #tpu.core_type<tc>, window_params = [{pipeline_mode = #tpu.pipeline_mode<synchronous>, transform_indices = @transform_0, window_bounds = array<i64: 2, 18, 2>}, {pipeline_mode = #tpu.pipeline_mode<synchronous>, transform_indices = @transform_1, window_bounds = array<i64: 6, 32>}, {pipeline_mode = #tpu.pipeline_mode<synchronous>, transform_indices = @transform_2, window_bounds = array<i64: 96, 32>}, {pipeline_mode = #tpu.pipeline_mode<synchronous>, transform_indices = @transform_3, window_bounds = array<i64: 32, 32>}, {pipeline_mode = #tpu.pipeline_mode<synchronous>, transform_indices = @transform_4, window_bounds = array<i64: 32, 32>}]} {
    %c0 = arith.constant 0 : index
    %c0_0 = arith.constant 0 : index
    %c0_1 = arith.constant 0 : index
    %0 = vector.load %arg1[%c0, %c0_0, %c0_1] : memref<2x18x2xf32, #tpu.memory_space<vmem>>, vector<1x18x2xf32>
    %1 = vector.shape_cast %0 : vector<1x18x2xf32> to vector<18x2xf32>
    %2 = vector.extract_strided_slice %1 {offsets = [0, 0], sizes = [16, 2], strides = [1, 1]} : vector<18x2xf32> to vector<16x2xf32>
    %3 = vector.extract_strided_slice %1 {offsets = [1, 0], sizes = [16, 2], strides = [1, 1]} : vector<18x2xf32> to vector<16x2xf32>
    %4 = vector.extract_strided_slice %1 {offsets = [2, 0], sizes = [16, 2], strides = [1, 1]} : vector<18x2xf32> to vector<16x2xf32>
    %5 = tpu.concatenate %2, %3, %4 in 1 : vector<16x2xf32>, vector<16x2xf32>, vector<16x2xf32> -> vector<16x6xf32>
    %c1 = arith.constant 1 : index
    %c0_2 = arith.constant 0 : index
    %c0_3 = arith.constant 0 : index
    %6 = vector.load %arg1[%c1, %c0_2, %c0_3] : memref<2x18x2xf32, #tpu.memory_space<vmem>>, vector<1x18x2xf32>
    %7 = vector.shape_cast %6 : vector<1x18x2xf32> to vector<18x2xf32>
    %8 = vector.extract_strided_slice %7 {offsets = [0, 0], sizes = [16, 2], strides = [1, 1]} : vector<18x2xf32> to vector<16x2xf32>
    %9 = vector.extract_strided_slice %7 {offsets = [1, 0], sizes = [16, 2], strides = [1, 1]} : vector<18x2xf32> to vector<16x2xf32>
    %10 = vector.extract_strided_slice %7 {offsets = [2, 0], sizes = [16, 2], strides = [1, 1]} : vector<18x2xf32> to vector<16x2xf32>
    %11 = tpu.concatenate %8, %9, %10 in 1 : vector<16x2xf32>, vector<16x2xf32>, vector<16x2xf32> -> vector<16x6xf32>
    %12 = tpu.concatenate %5, %11 in 0 : vector<16x6xf32>, vector<16x6xf32> -> vector<32x6xf32>
    %13 = arith.truncf %12 : vector<32x6xf32> to vector<32x6xbf16>
    %c0_4 = arith.constant 0 : index
    %c0_5 = arith.constant 0 : index
    %14 = vector.load %arg2[%c0_4, %c0_5] : memref<6x32xbf16, #tpu.memory_space<vmem>>, vector<6x32xbf16>
    %cst = arith.constant dense<0.000000e+00> : vector<32x32xf32>
    %15 = tpu.matmul %13, %14, %cst {dimension_numbers = #tpu.dot_dimension_numbers<[1], [0], [0], [1], [0, 0, 1, 1], [], []>} : vector<32x6xbf16>, vector<6x32xbf16>, vector<32x32xf32> -> vector<32x32xf32>
    %cst_6 = arith.constant 0.000000e+00 : f32
    %16 = vector.broadcast %cst_6 : f32 to vector<32x32xf32>
    %17 = arith.maximumf %15, %16 : vector<32x32xf32>
    %18 = vector.extract_strided_slice %17 {offsets = [0, 0], sizes = [16, 32], strides = [1, 1]} : vector<32x32xf32> to vector<16x32xf32>
    %c1_i32 = arith.constant 1 : i32
    %19 = tpu.dynamic_rotate %18 by %c1_i32 dim 0 : vector<16x32xf32>, i32 -> vector<16x32xf32>
    %c15_i32 = arith.constant 15 : i32
    %20 = tpu.dynamic_rotate %18 by %c15_i32 dim 0 : vector<16x32xf32>, i32 -> vector<16x32xf32>
    %21 = vector.extract_strided_slice %17 {offsets = [16, 0], sizes = [16, 32], strides = [1, 1]} : vector<32x32xf32> to vector<16x32xf32>
    %c1_i32_7 = arith.constant 1 : i32
    %22 = tpu.dynamic_rotate %21 by %c1_i32_7 dim 0 : vector<16x32xf32>, i32 -> vector<16x32xf32>
    %c15_i32_8 = arith.constant 15 : i32
    %23 = tpu.dynamic_rotate %21 by %c15_i32_8 dim 0 : vector<16x32xf32>, i32 -> vector<16x32xf32>
    %24 = tpu.concatenate %19, %22 in 0 : vector<16x32xf32>, vector<16x32xf32> -> vector<32x32xf32>
    %25 = tpu.concatenate %20, %23 in 0 : vector<16x32xf32>, vector<16x32xf32> -> vector<32x32xf32>
    %26 = tpu.concatenate %24, %17, %25 in 1 : vector<32x32xf32>, vector<32x32xf32>, vector<32x32xf32> -> vector<32x96xf32>
    %27 = arith.truncf %26 : vector<32x96xf32> to vector<32x96xbf16>
    %c0_9 = arith.constant 0 : index
    %c0_10 = arith.constant 0 : index
    %28 = vector.load %arg3[%c0_9, %c0_10] : memref<96x32xbf16, #tpu.memory_space<vmem>>, vector<96x32xbf16>
    %cst_11 = arith.constant dense<0.000000e+00> : vector<32x32xf32>
    %29 = tpu.matmul %27, %28, %cst_11 {dimension_numbers = #tpu.dot_dimension_numbers<[1], [0], [0], [1], [0, 0, 1, 1], [], []>} : vector<32x96xbf16>, vector<96x32xbf16>, vector<32x32xf32> -> vector<32x32xf32>
    %c0_12 = arith.constant 0 : index
    %c0_13 = arith.constant 0 : index
    %30 = vector.load %arg4[%c0_12, %c0_13] : memref<32x32xf32, #tpu.memory_space<vmem>>, vector<32x32xf32>
    %31 = arith.addf %29, %30 : vector<32x32xf32>
    %c0_14 = arith.constant 0 : index
    %c0_15 = arith.constant 0 : index
    %32 = vector.load %arg5[%c0_14, %c0_15] : memref<32x32xf32, #tpu.memory_space<vmem>>, vector<32x32xf32>
    tpu.vector_store %arg5[%c0_14, %c0_15], %31 {strides = array<i32>} : memref<32x32xf32, #tpu.memory_space<vmem>>, vector<32x32xf32>,
    return
  }
  func.func @transform_0(%arg0: i32) -> (i32, i32, i32) {
    %c0_i32 = arith.constant 0 : i32
    %c0_i32_0 = arith.constant 0 : i32
    %c0_i32_1 = arith.constant 0 : i32
    %c0_i32_2 = arith.constant 0 : i32
    return %c0_i32, %c0_i32_0, %c0_i32_1 : i32, i32, i32
  }
  func.func @transform_1(%arg0: i32) -> (i32, i32) {
    %c0_i32 = arith.constant 0 : i32
    %c0_i32_0 = arith.constant 0 : i32
    %c0_i32_1 = arith.constant 0 : i32
    return %c0_i32, %c0_i32_0 : i32, i32
  }
  func.func @transform_2(%arg0: i32) -> (i32, i32) {
    %c0_i32 = arith.constant 0 : i32
    %c0_i32_0 = arith.constant 0 : i32
    %c0_i32_1 = arith.constant 0 : i32
    return %c0_i32, %c0_i32_0 : i32, i32
  }
  func.func @transform_3(%arg0: i32) -> (i32, i32) {
    %c0_i32 = arith.constant 0 : i32
    %c0_i32_0 = arith.constant 0 : i32
    %c0_i32_1 = arith.constant 0 : i32
    return %c0_i32, %c0_i32_0 : i32, i32
  }
  func.func @transform_4(%arg0: i32) -> (i32, i32) {
    %c0_i32 = arith.constant 0 : i32
    %c0_i32_0 = arith.constant 0 : i32
    %c0_i32_1 = arith.constant 0 : i32
    return %c0_i32, %c0_i32_0 : i32, i32
  }
}

</mosaic_0001>

<bundles_post_ra>
// kernel: tpu_custom_call.1
= control target key start
LH: loop header
LB: loop body
LE: loop exit
PB: predicated region body
PF: predicated region fallthrough
CT: control target
= control target key end

     0   :  { %vm25_vm0 = vcmask 1046528   ;;  %vm37_vm1 = vcmask 1045504   ;;  %s469_s28 = smov 2   ;;  %vm98_vm2 = vcmask 1042432   ;;  %s579_s0 = inlined_call_operand.vmem [shape: f32[2,18,2], index: 0, kind: input, shape index: {}]   ;;  %s580_s1 = inlined_call_operand.vmem [shape: bf16[6,32], index: 1, kind: input, shape index: {}]   ;;  %s581_s2 = inlined_call_operand.vmem [shape: bf16[96,32], index: 2, kind: input, shape index: {}]   ;;  %s582_s3 = inlined_call_operand.vmem [shape: f32[32,32], index: 3, kind: input, shape index: {}]   ;;  %s583_s4 = inlined_call_operand.hbm [shape: f32[32,32], index: 4, kind: output, shape index: {}]  }
   0x1   :  { %v347_v0 = vld [vmem:[%s579_s0 + $0x18] sm:$0xff]  ;;  %v348_v1 = vld [vmem:[%s579_s0 + $0x20] sm:$0xff]  ;;  %v349_v2 = vld [vmem:[%s579_s0 + $0x28] sm:$0x3] }
   0x2   :  { %v62_v3 = vrot.slane %v347_v0, 1  ;;  %v63_v4 = vrot.slane %v348_v1, 1  ;;  %v65_v5 = vrot.slane %v349_v2, 1  ;;  %v19_v6 = vld [vmem:[%s579_s0] sm:$0xff]  ;;  %v20_v7 = vld [vmem:[%s579_s0 + $0x8] sm:$0xff]  ;;  %v76_v8 = vrot.slane %v349_v2, 2 }
   0x3   :  { %v21_v9 = vld [vmem:[%s579_s0 + $0x10] sm:$0x3]  ;;  %v26_v10 = vrot.slane %v19_v6, 1  ;;  %v27_v11 = vrot.slane %v20_v7, 1  ;;  %v73_v18 = vrot.slane %v347_v0, 2  ;;  %v74_v19 = vrot.slane %v348_v1, 2 }
   0x4   :  { %v64_v12 = vsel %vm25_vm0, %v62_v3, %v63_v4  ;;  %v66_v13 = vsel %vm25_vm0, %v63_v4, %v65_v5  ;;  %v29_v14 = vrot.slane %v21_v9, 1  ;;  %v41_v15 = vrot.slane %v21_v9, 2  ;;  %v90_v23 = vld [vmem:[%s580_s1] sm:$0x7] }
   0x5   :  { %v411_v16 = vpack.i.bf16 %v66_v13, %v64_v12  ;;  %v28_v17 = vsel %vm25_vm0, %v26_v10, %v27_v11  ;;  %v38_v21 = vrot.slane %v19_v6, 2  ;;  %v39_v22 = vrot.slane %v20_v7, 2  ;;  %393 = vmatprep.subr.msk.bf16.mxu0 %vm98_vm2, %v90_v23 }
   0x6   :  { %v30_v20 = vsel %vm25_vm0, %v27_v11, %v29_v14  ;;  %v75_v25 = vsel %vm37_vm1, %v73_v18, %v74_v19  ;;  %v77_v26 = vsel %vm37_vm1, %v74_v19, %v76_v8  ;;  %v100_v31 = vsel %vm98_vm2, %v90_v23, 0 }
   0x7   :  { %412 = vrot.lane.b32.xlu1 %v411_v16, %s469_s28  ;;  %v401_v24 = vpack.i.bf16 %v30_v20, %v28_v17  ;;  %v416_v27 = vpack.i.bf16 %v77_v26, %v75_v25  ;;  %v40_v28 = vsel %vm37_vm1, %v38_v21, %v39_v22  ;;  %v42_v29 = vsel %vm37_vm1, %v39_v22, %v41_v15 }
   0x8   :  { %v406_v30 = vpack.i.bf16 %v42_v29, %v40_v28  ;;  %372 = vmatpush3.bf16.msra.mxu0 %v100_v31 }
   0x9   :  { %402 = vrot.lane.b32.xlu0 %v401_v24, %s469_s28 }
   0xa   :  { %9 = vsyncpa [#allocation3], 0  ;;  %s470_s1 = smov 4   ;;  %vm49_vm3 = vcmask 15360   ;;  %vm52_vm4 = vcmask 31744   ;;  %vm91_vm5 = vcmask 48128   ;;  %v157_v58 = vlaneseq }
   0xb   :  { %417 = vrot.lane.b32.xlu1 %v416_v27, %s470_s1  ;;  %v441_v54 = vld [vmem:[%s581_s2 + $0x28] sm:$0xff]   ;;  %v442_v55 = vld [vmem:[%s581_s2 + $0x20] sm:$0xff]   ;;  %v443_v56 = vld [vmem:[%s581_s2 + $0x18] sm:$0xff]   ;;  %s471_s15 = smov 32   ;;  %vm207_vm8 = vcmask 261120   ;;  %vm212_vm9 = vcmask 523264  }
   0xc   :  { %377 = vmatprep.subr.bf16.mxu1 %v441_v54  ;;  %v444_v57 = vld [vmem:[%s581_s2 + $0x10] sm:$0xff]   ;;  %v445_v59 = vld [vmem:[%s581_s2 + $0x8] sm:$0xff]   ;;  %v158_v63 = vshrl.u32 %v157_v58, 7  ;;  %vm271_vm10 = vcmask 785408   ;;  %s473_s24 = smov [#allocation2]  }
   0xd   :  { %407 = vrot.lane.b32.xlu0 %v406_v30, %s470_s1  ;;  %378 = vmatpush3.bf16.msra.mxu1 %v441_v54  ;;  %s336_s25 = sshll.u32 %s473_s24, 4  ;;  %s337_s25 = int_to_ptr.vmem [resolvable:$true] %s336_s25 }
   0xe   :  { %379 = vmatprep.subr.bf16.mxu1 %v442_v55  ;;  %vm164_vm6 = vcmp.lt.s32.totalorder %v158_v63, 7  ;;  %vm159_vm7 = vcmp.lt.s32.totalorder %v158_v63, 1  ;;  %s447_s26 = scalar_lea.vmem %s337_s25, 512  ;;  %p452_p1 = scmp.lt.s32.totalorder %s337_s25, %s337_s25 }
   0xf   :  { %p448_p0 = scmp.ne.s32.totalorder %s337_s25, %s447_s26  ;;  %p453_p2 = scmp.lt.s32.totalorder %s447_s26, %s447_s26 }
  0x11   :  { %380 = vmatpush3.bf16.msra.mxu1 %v442_v55  ;;  %p454_p3 = por %p453_p2, %p452_p1 }
  0x12   :  { %381 = vmatprep.subr.bf16.mxu1 %v443_v56 }
  0x13   :  { %p455_p4 = pnand %p454_p3, %p448_p0 }
  0x15   :  { %382 = vmatpush3.bf16.msra.mxu1 %v443_v56  ;;  %v232_v56 = vld [vmem:[%s582_s3 + $0x8] sm:$0xff] }
  0x16   :  { %383 = vmatprep.subr.bf16.mxu1 %v444_v57 }
  0x19   :  { %384 = vmatpush3.bf16.msra.mxu1 %v444_v57 }
  0x1a   :  { %385 = vmatprep.subr.bf16.mxu1 %v445_v59 }
  0x1d   :  { %386 = vmatpush3.bf16.msra.mxu1 %v445_v59 }
  0x79   :  { %v413_v32 = vpop.permute.xlu1 %412 }
  0x7a   :  { %v415_v33 = vunpack.i.h.bf16 %v413_v32  ;;  %v414_v34 = vunpack.i.l.bf16 %v413_v32 }
  0x7b   :  { %v403_v35 = vpop.permute.xlu0 %402 }
  0x7c   :  { %v405_v36 = vunpack.i.h.bf16 %v403_v35  ;;  %v404_v37 = vunpack.i.l.bf16 %v403_v35  ;;  %v85_v41 = vsel %vm49_vm3, %v348_v1, %v415_v33  ;;  %v84_v42 = vsel %vm49_vm3, %v347_v0, %v414_v34  ;;  %v446_v0 = vld [vmem:[%s581_s2] sm:$0xff]   ;;  %s472_s2 = smov 64  }
  0x7d   :  { %v418_v38 = vpop.permute.xlu1 %417  ;;  %387 = vmatprep.subr.bf16.mxu1 %v446_v0 }
  0x7e   :  { %v420_v39 = vunpack.i.h.bf16 %v418_v38  ;;  %v419_v40 = vunpack.i.l.bf16 %v418_v38  ;;  %v50_v48 = vsel %vm49_vm3, %v19_v6, %v404_v37  ;;  %v51_v49 = vsel %vm49_vm3, %v20_v7, %v405_v36  ;;  %388 = vmatpush3.bf16.msra.mxu1 %v446_v0 }
  0x7f   :  { %v408_v43 = vpop.permute.xlu0 %407 }
  0x80   :  { %v86_v44 = vsel %vm52_vm4, %v84_v42, %v419_v40  ;;  %v87_v45 = vsel %vm52_vm4, %v85_v41, %v420_v39  ;;  %v410_v46 = vunpack.i.h.bf16 %v408_v43  ;;  %v409_v47 = vunpack.i.l.bf16 %v408_v43 }
  0x81   :  { %v89_v50 = vpack.c.bf16 %v87_v45, %v86_v44 }
  0x82   :  { %v53_v51 = vsel %vm52_vm4, %v50_v48, %v409_v47  ;;  %v54_v52 = vsel %vm52_vm4, %v51_v49, %v410_v46  ;;  %v233_v48 = vld [vmem:[%s582_s3 + $0x10] sm:$0xff] }
  0x83   :  { %v88_v53 = vpack.c.bf16 %v54_v52, %v53_v51 }
  0x85   :  { %373 = vmatprep.mubr.msk.bf16.mxu0 %vm91_vm5, %v88_v53  ;;  %v234_v53 = vld [vmem:[%s582_s3 + $0x18] sm:$0xff] }
  0x86   :  { %374 = vmatmul.mubr.msk.bf16.vlgmr.msra.gmra.mxu0 %vm91_vm5, %v89_v50  ;;  %v231_v50 = vld [vmem:[%s582_s3] sm:$0xff] }
 0x146   :  { %v375_v60 = vpop.f32.mrf.mxu0 }
 0x147   :  { %v153_v61 = vmax.f32 %v375_v60, 0.0 }
 0x148   :  { %v136_v62 = vpop.f32.mrf.mxu0 }
 0x149   :  { %v151_v1 = vmax.f32 %v136_v62, 0.0  ;;  %v171_v4 = vrot.slane %v153_v61, 1  ;;  %v167_v10 = vrot.slane %v153_v61, 7 }
 0x14a   :  { %v376_v2 = vpop.f32.mrf.mxu0 }
 0x14b   :  { %v154_v3 = vmax.f32 %v376_v2, 0.0  ;;  %v155_v11 = vrot.slane %v151_v1, 7  ;;  %v162_v12 = vrot.slane %v151_v1, 1 }
 0x14c   :  { %v139_v5 = vpop.f32.mrf.mxu0 }
 0x14d   :  { %v168_v6 = vrot.slane %v154_v3, 7  ;;  %v172_v7 = vrot.slane %v154_v3, 1  ;;  %v152_v8 = vmax.f32 %v139_v5, 0.0  ;;  %v421_v9 = vpack.i.bf16 %v154_v3, %v153_v61 }
 0x14f   :  { %v156_v13 = vrot.slane %v152_v8, 7  ;;  %v163_v14 = vrot.slane %v152_v8, 1  ;;  %422 = vrot.lane.b32.xlu1 %v421_v9, %s471_s15  ;;  %v426_v15 = vpack.i.bf16 %v152_v8, %v151_v1  ;;  %v173_v16 = vsel %vm164_vm6, %v171_v4, %v172_v7 }
 0x150   :  { %v174_v17 = vsel %vm164_vm6, %v172_v7, %v171_v4  ;;  %v169_v18 = vsel %vm159_vm7, %v167_v10, %v168_v6  ;;  %v170_v19 = vsel %vm159_vm7, %v168_v6, %v167_v10 }
 0x151   :  { %427 = vrot.lane.b32.xlu0 %v426_v15, %s471_s15  ;;  %v436_v20 = vpack.i.bf16 %v174_v17, %v173_v16  ;;  %v165_v21 = vsel %vm164_vm6, %v162_v12, %v163_v14  ;;  %v166_v22 = vsel %vm164_vm6, %v163_v14, %v162_v12  ;;  %v160_v23 = vsel %vm159_vm7, %v155_v11, %v156_v13 }
 0x152   :  { %v431_v24 = vpack.i.bf16 %v166_v22, %v165_v21  ;;  %v161_v25 = vsel %vm159_vm7, %v156_v13, %v155_v11 }
 0x153   :  { %437 = vrot.lane.b32.xlu1 %v436_v20, %s472_s2 }
 0x155   :  { %432 = vrot.lane.b32.xlu0 %v431_v24, %s472_s2 }
 0x1c1   :  { %v423_v26 = vpop.permute.xlu1 %422 }
 0x1c2   :  { %v425_v27 = vunpack.i.h.bf16 %v423_v26  ;;  %v424_v28 = vunpack.i.l.bf16 %v423_v26 }
 0x1c3   :  { %v428_v29 = vpop.permute.xlu0 %427 }
 0x1c4   :  { %v430_v30 = vunpack.i.h.bf16 %v428_v29  ;;  %v429_v31 = vunpack.i.l.bf16 %v428_v29  ;;  %v210_v35 = vsel %vm207_vm8, %v170_v19, %v424_v28  ;;  %v211_v36 = vsel %vm207_vm8, %v169_v18, %v425_v27 }
 0x1c5   :  { %v438_v32 = vpop.permute.xlu1 %437 }
 0x1c6   :  { %v440_v33 = vunpack.i.h.bf16 %v438_v32  ;;  %v439_v34 = vunpack.i.l.bf16 %v438_v32  ;;  %v208_v43 = vsel %vm207_vm8, %v161_v25, %v429_v31  ;;  %v209_v44 = vsel %vm207_vm8, %v160_v23, %v430_v30 }
 0x1c7   :  { %v433_v37 = vpop.permute.xlu0 %432 }
 0x1c8   :  { %v215_v38 = vsel %vm212_vm9, %v210_v35, %v439_v34  ;;  %v216_v39 = vsel %vm212_vm9, %v211_v36, %v440_v33  ;;  %v435_v40 = vunpack.i.h.bf16 %v433_v37  ;;  %v434_v41 = vunpack.i.l.bf16 %v433_v37 }
 0x1c9   :  { %v218_v42 = vpack.c.bf16 %v216_v39, %v215_v38 }
 0x1ca   :  { %v213_v45 = vsel %vm212_vm9, %v208_v43, %v434_v41  ;;  %v214_v46 = vsel %vm212_vm9, %v209_v44, %v435_v40 }
 0x1cb   :  { %v217_v47 = vpack.c.bf16 %v214_v46, %v213_v45 }
 0x1cd   :  { %389 = vmatprep.mubr.msk.bf16.mxu1 %vm271_vm10, %v217_v47 }
 0x1ce   :  { %390 = vmatmul.mubr.msk.bf16.vlgmr.msra.gmra.mxu1 %vm271_vm10, %v218_v42 }
 0x28e   :  { %v391_v49 = vpop.f32.mrf.mxu1 }
 0x28f   :  { %v321_v51 = vadd.f32 %v391_v49, %v233_v48 }
 0x290   :  { %v312_v52 = vpop.f32.mrf.mxu1 }
 0x291   :  { %329 = vst.msk [vmem:[#allocation2 + $0x10] sm:$0xff] %vm207_vm8, %v321_v51  ;;  %v313_v54 = vadd.f32 %v312_v52, %v231_v50 }
 0x292   :  { %v392_v55 = vpop.f32.mrf.mxu1 }
 0x293   :  { %327 = vst.msk [vmem:[#allocation2] sm:$0xff] %vm207_vm8, %v313_v54  ;;  %v324_v57 = vadd.f32 %v392_v55, %v234_v53 }
 0x294   :  { %v315_v58 = vpop.f32.mrf.mxu1 }
 0x295   :  { %330 = vst.msk [vmem:[#allocation2 + $0x18] sm:$0xff] %vm207_vm8, %v324_v57  ;;  %v316_v59 = vadd.f32 %v315_v58, %v232_v56 }
 0x297   :  { %328 = vst.msk [vmem:[#allocation2 + $0x8] sm:$0xff] %vm207_vm8, %v316_v59 }
 0x298   :  { %458 = shalt.err (!%p455_p4)
}
 0x299   :  { %s474_s3 = smov 128   ;;  %s475_s27 = smov 8  }
 0x29a   :  { %342 = dma.vmem_to_hbm [thread:$0]  %s337_s25, 512, %s583_s4, [#allocation3], %s474_s3, %s474_s3, %s475_s27  }
 0x29b   :  { %467 = dma.done.wait [#allocation3], 512  }
 0x29c   :  { %468 = vsyncadd [#allocation3], 4294966784 }
 0x29d   :  { %346 = vsyncpa [#allocation3], 1 }

</bundles_post_ra>
